<compile_context>
chip_gen: v5e
topology: v5e:2x2
jax: 0.10.0
libtpu: 0.0.40
codegen_flags: <defaults>
</compile_context>

<pallas_src>
import functools

import jax
import jax.numpy as jnp
import numpy as np
from jax.experimental import pallas as pl
from jax.experimental.pallas import tpu as pltpu


def make_pe_table(d_model: int, max_len: int = 512, dtype=jnp.float32):
    """Deterministic sinusoidal PE table, same math as the PyTorch __init__."""
    position = np.arange(max_len, dtype=np.float64)[:, None]                 # (max_len, 1)
    div_term = np.exp(np.arange(0, d_model, 2, dtype=np.float64)
                      * (-np.log(10000.0) / d_model))                        # (d_model/2,)
    pe = np.zeros((max_len, 1, d_model), dtype=np.float32)
    pe[:, 0, 0::2] = np.sin(position * div_term)
    pe[:, 0, 1::2] = np.cos(position * div_term)
    return jnp.asarray(pe, dtype=dtype)


def _round_up(x, m):
    return ((x + m - 1) // m) * m


def _vmem_capacity_bytes():
    try:
        return int(pltpu.get_tpu_info().vmem_capacity_bytes)
    except Exception:
        return 64 * 1024 * 1024        # conservative fallback: v7x per-TC VMEM


def _choose_tiles(S, B, D, itemsize, vmem_cap, heavy_temps):
    """Pick (seq_tile, batch_tile): biggest padded x/out block whose double
    buffers (+ dropout temps) stay comfortably inside the scoped VMEM."""
    lane_bytes = _round_up(D, 128) * itemsize        # padded bytes per d_model row
    divisor = 32 if heavy_temps else 16              # dropout keeps big u32/f32 temps
    target = int(min(8 * 2 ** 20, max(2 * 2 ** 20, vmem_cap // divisor)))

    tb = B if B <= 8 else (B // 8) * 8               # full B, or a multiple of 8
    while tb > 8 and _round_up(tb, 8) * lane_bytes * 8 > target:
        tb -= 8                                      # leave room for >= 8 seq rows

    row_bytes = _round_up(tb, 8) * lane_bytes        # padded bytes per seq row
    ts = max(8, (target // row_bytes) // 8 * 8)      # multiple of 8 (pe block rule)
    ts = min(ts, _round_up(S, 8))

    # Keep >= 2 grid blocks so both v7x TensorCores get work ("parallel" axes).
    if pl.cdiv(S, ts) * pl.cdiv(B, tb) < 2 and S > 8:
        ts = max(8, _round_up(pl.cdiv(S, 2), 8))
    return ts, tb


def _pe_add_kernel(x_ref, pe_ref, o_ref):
    # eval-mode forward: out = x + pe (pe broadcasts over the batch tile),
    # add in f32 (pe is f32), cast only on the store.
    y = x_ref[...].astype(jnp.float32) + pe_ref[...][:, None, :]
    o_ref[...] = y.astype(o_ref.dtype)


def _pe_add_dropout_kernel(x_ref, pe_ref, seed_ref, o_ref, *, p, full_B, full_D):
    # training-mode forward: (x + pe) * Bernoulli(keep=1-p) / (1-p)
    # NOTE: distribution matches torch dropout; the exact RNG stream cannot.
    ts, tb, D = x_ref.shape
    i = pl.program_id(0)
    j = pl.program_id(1)

    y = x_ref[...].astype(jnp.float32) + pe_ref[...][:, None, :]

    # Counter-based Bernoulli mask: lowbias32 hash of the global element index
    # mixed with the seed.  Plain 32-bit VPU integer ops -> lowers everywhere.
    shp = (ts, tb, D)
    s_idx = (jax.lax.broadcasted_iota(jnp.int32, shp, 0) + i * ts).astype(jnp.uint32)
    b_idx = (jax.lax.broadcasted_iota(jnp.int32, shp, 1) + j * tb).astype(jnp.uint32)
    d_idx = jax.lax.broadcasted_iota(jnp.int32, shp, 2).astype(jnp.uint32)
    stride_s = jnp.uint32((full_B * full_D) & 0xFFFFFFFF)
    stride_b = jnp.uint32(full_D & 0xFFFFFFFF)
    h = s_idx * stride_s + b_idx * stride_b + d_idx          # global flat index (mod 2^32)

    key = (seed_ref[0].astype(jnp.uint32) * jnp.uint32(0x9E3779B9)
           + jnp.uint32(0x85EBCA6B))
    h = h ^ key
    h = h ^ (h >> 16)
    h = h * jnp.uint32(0x7FEB352D)
    h = h ^ (h >> 15)
    h = h * jnp.uint32(0x846CA68B)
    h = h ^ (h >> 16)

    keep_threshold = jnp.uint32(min(int(round((1.0 - p) * 2.0 ** 32)), 2 ** 32 - 1))
    keep = h < keep_threshold
    scale = jnp.float32(1.0 / (1.0 - p))                     # f32 scale (no bf16 bias)
    o_ref[...] = jnp.where(keep, y * scale, jnp.float32(0.0)).astype(o_ref.dtype)


def positional_encoding(x, pe, *, dropout_p=0.1, training=False, seed=0,
                        seq_tile=None, batch_tile=None):
    """Pallas forward of PositionalEncoding. x: (S, B, D), pe: (max_len, 1, D)."""
    S, B, D = x.shape
    pe2d = pe.reshape(pe.shape[0], pe.shape[-1]) if pe.ndim == 3 else pe
    assert S <= pe2d.shape[0], "sequence length exceeds the PE table"
    assert pe2d.shape[-1] == D
    pe2d = pe2d.astype(jnp.float32)          # keep the PE add in f32 (torch parity)

    use_dropout = training and dropout_p > 0.0
    if use_dropout and dropout_p >= 1.0:     # degenerate torch case: drop everything
        return jnp.zeros_like(x)

    vmem_cap = _vmem_capacity_bytes()
    ts, tb = _choose_tiles(S, B, D, jnp.dtype(x.dtype).itemsize, vmem_cap,
                           heavy_temps=use_dropout)
    if seq_tile is not None:
        assert seq_tile % 8 == 0, "seq_tile must be a multiple of 8"
        ts = seq_tile
    if batch_tile is not None:
        assert batch_tile == B or batch_tile % 8 == 0, \
            "batch_tile must equal B or be a multiple of 8"
        tb = batch_tile

    grid = (pl.cdiv(S, ts), pl.cdiv(B, tb))  # ragged tail blocks masked by Pallas

    # Last two x/out block dims are (tb, D): tb is a multiple of 8 or the full
    # batch, D is the full feature dim -> Mosaic (8,128)/full-dim rule holds.
    x_spec = pl.BlockSpec((ts, tb, D), lambda i, j: (i, j, 0))
    pe_spec = pl.BlockSpec((ts, D), lambda i, j: (i, 0))      # batch dim squeezed
    out_spec = pl.BlockSpec((ts, tb, D), lambda i, j: (i, j, 0))
    out_shape = jax.ShapeDtypeStruct((S, B, D), x.dtype)

    vmem_limit = int(max(32 * 1024 * 1024,
                         min(0.75 * vmem_cap, 100 * 1024 * 1024)))
    cparams = pltpu.CompilerParams(
        dimension_semantics=("parallel", "parallel"),
        vmem_limit_bytes=vmem_limit)

    if not use_dropout:
        return pl.pallas_call(
            _pe_add_kernel,
            out_shape=out_shape,
            grid=grid,
            in_specs=[x_spec, pe_spec],
            out_specs=out_spec,
            input_output_aliases={0: 0},     # x block is read before rewrite
            compiler_params=cparams,
        )(x, pe2d)

    seed_arr = jnp.asarray([seed], dtype=jnp.int32)
    seed_spec = pl.BlockSpec(memory_space=pltpu.MemorySpace.SMEM)
    kernel = functools.partial(_pe_add_dropout_kernel, p=float(dropout_p),
                               full_B=B, full_D=D)
    return pl.pallas_call(
        kernel,
        out_shape=out_shape,
        grid=grid,
        in_specs=[x_spec, pe_spec, seed_spec],
        out_specs=out_spec,
        input_output_aliases={0: 0},
        compiler_params=cparams,
    )(x, pe2d, seed_arr)


if __name__ == "__main__":
    dropout_p = 0.1
    key = jax.random.PRNGKey(0)
    k1, k2, k3 = jax.random.split(key, 3)

    # ---- test 1: module-sized small shape (S=8, B=2, D=32) ----
    S, B, D = 8, 2, 32
    x = jax.random.normal(k1, (S, B, D), dtype=jnp.float32)
    pe = make_pe_table(D, max_len=512)
    ref = np.asarray(x) + np.asarray(pe[:S])                  # broadcasts over batch

    y_eval = jax.block_until_ready(
        positional_encoding(x, pe, dropout_p=dropout_p, training=False))
    assert y_eval.shape == (S, B, D)
    np.testing.assert_allclose(np.asarray(y_eval), ref, rtol=1e-6, atol=1e-6)

    y_tr = jax.block_until_ready(
        positional_encoding(x, pe, dropout_p=dropout_p, training=True, seed=123))
    y_tr_np = np.asarray(y_tr)
    kept = y_tr_np != 0.0
    np.testing.assert_allclose(y_tr_np[kept], (ref / (1.0 - dropout_p))[kept],
                               rtol=1e-5, atol=1e-5)
    assert kept.mean() > 0.5                                  # most kept at p=0.1

    # ---- test 2: multi-block grid (explicit tiles) to exercise the pipeline ----
    S2, B2, D2 = 64, 8, 128
    x2 = jax.random.normal(k2, (S2, B2, D2), dtype=jnp.float32)
    pe2 = make_pe_table(D2, max_len=512)
    ref2 = np.asarray(x2) + np.asarray(pe2[:S2])

    y2 = jax.block_until_ready(
        positional_encoding(x2, pe2, dropout_p=dropout_p, training=False,
                            seq_tile=16, batch_tile=8))       # grid = (4, 1)
    np.testing.assert_allclose(np.asarray(y2), ref2, rtol=1e-6, atol=1e-6)

    y2_tr = jax.block_until_ready(
        positional_encoding(x2, pe2, dropout_p=dropout_p, training=True,
                            seed=7, seq_tile=16, batch_tile=8))
    y2_tr_np = np.asarray(y2_tr)
    kept2 = y2_tr_np != 0.0
    np.testing.assert_allclose(y2_tr_np[kept2],
                               (ref2 / (1.0 - dropout_p))[kept2],
                               rtol=1e-5, atol=1e-5)

    # ---- test 3: ragged seq tail (cdiv grid masks the partial block) ----
    S3, B3, D3 = 40, 2, 32
    x3 = jax.random.normal(k3, (S3, B3, D3), dtype=jnp.float32)
    pe3 = make_pe_table(D3, max_len=512)
    ref3 = np.asarray(x3) + np.asarray(pe3[:S3])
    y3 = jax.block_until_ready(
        positional_encoding(x3, pe3, training=False, seq_tile=16))  # grid = (3, 1)
    np.testing.assert_allclose(np.asarray(y3), ref3, rtol=1e-6, atol=1e-6)

    print("KERNEL_OK")
</pallas_src>

<mosaic_0001>
module attributes {stable_mosaic.version = 11 : i64} {
  func.func @_pe_add_kernel(%arg0: i32, %arg1: i32, %arg2: memref<8x2x32xf32, #tpu.memory_space<vmem>>, %arg3: memref<8x32xf32, #tpu.memory_space<vmem>>, %arg4: memref<8x2x32xf32, #tpu.memory_space<vmem>>) attributes {dimension_semantics = [#tpu.dimension_semantics<parallel>, #tpu.dimension_semantics<parallel>], iteration_bounds = array<i64: 1, 1>, scalar_prefetch = 0 : i64, scratch_operands = 0 : i64, tpu.core_type = #tpu.core_type<tc>, window_params = [{transform_indices = @transform_0, window_bounds = array<i64: 8, 2, 32>}, {transform_indices = @transform_1, window_bounds = array<i64: 8, 32>}, {transform_indices = @transform_2, window_bounds = array<i64: 8, 2, 32>}]} {
    %c0 = arith.constant 0 : index
    %c0_0 = arith.constant 0 : index
    %c0_1 = arith.constant 0 : index
    %0 = vector.load %arg2[%c0, %c0_0, %c0_1] : memref<8x2x32xf32, #tpu.memory_space<vmem>>, vector<8x2x32xf32>
    %c0_2 = arith.constant 0 : index
    %c0_3 = arith.constant 0 : index
    %1 = vector.load %arg3[%c0_2, %c0_3] : memref<8x32xf32, #tpu.memory_space<vmem>>, vector<8x32xf32>
    %2 = vector.shape_cast %1 : vector<8x32xf32> to vector<8x1x32xf32>
    %3 = vector.broadcast %2 : vector<8x1x32xf32> to vector<8x2x32xf32>
    %4 = arith.addf %0, %3 : vector<8x2x32xf32>
    %c0_4 = arith.constant 0 : index
    %c0_5 = arith.constant 0 : index
    %c0_6 = arith.constant 0 : index
    %5 = vector.load %arg4[%c0_4, %c0_5, %c0_6] : memref<8x2x32xf32, #tpu.memory_space<vmem>>, vector<8x2x32xf32>
    tpu.vector_store %arg4[%c0_4, %c0_5, %c0_6], %4 {strides = array<i32>} : memref<8x2x32xf32, #tpu.memory_space<vmem>>, vector<8x2x32xf32>,
    return
  }
  func.func @transform_0(%arg0: i32, %arg1: i32) -> (i32, i32, i32) {
    %c0_i32 = arith.constant 0 : i32
    %c0_i32_0 = arith.constant 0 : i32
    return %arg0, %arg1, %c0_i32 : i32, i32, i32
  }
  func.func @transform_1(%arg0: i32, %arg1: i32) -> (i32, i32) {
    %c0_i32 = arith.constant 0 : i32
    %c0_i32_0 = arith.constant 0 : i32
    return %arg0, %c0_i32 : i32, i32
  }
  func.func @transform_2(%arg0: i32, %arg1: i32) -> (i32, i32, i32) {
    %c0_i32 = arith.constant 0 : i32
    %c0_i32_0 = arith.constant 0 : i32
    return %arg0, %arg1, %c0_i32 : i32, i32, i32
  }
}

</mosaic_0001>

<bundles_post_ra>
// kernel: tpu_custom_call.1
= control target key start
LH: loop header
LB: loop body
LE: loop exit
PB: predicated region body
PF: predicated region fallthrough
CT: control target
= control target key end

     0   :  { %7 = vsyncpa [#allocation3], 0  ;;  %s195_s0 = inlined_call_operand.hbm [shape: f32[8,2,32], index: 0, kind: input, shape index: {}, may-alias: {0,2}]   ;;  %s196_s1 = inlined_call_operand.vmem [shape: f32[512,32], index: 1, kind: input, shape index: {}]   ;;  %s197_s2 = inlined_call_operand.hbm [shape: f32[8,2,32], index: 2, kind: output, shape index: {}, may-alias: {0,2}]  }
   0x1   :  { %8 = vsyncpa [#allocation4], 0  ;;  %s13_s11 = sshll.u32 %s195_s0, 4  ;;  %s153_s12 = smov [#allocation2]   ;;  %s14_s11 = int_to_ptr.hbm [resolvable:$true] %s13_s11 }
   0x2   :  { %s15_s13 = sshll.u32 %s153_s12, 4  ;;  %s154_s14 = smov 32   ;;  %s16_s13 = int_to_ptr.vmem [resolvable:$true] %s15_s13 }
   0x3   :  { %s155_s15 = smov 2  }
   0x4   :  { %21 = dma.hbm_to_vmem [thread:$0]  %s14_s11, 256, %s16_s13, [#allocation3], %s154_s14, %s154_s14, %s155_s15  }
   0x5   :  { %149 = dma.done.wait [#allocation3], 256  }
   0x6   :  { %150 = vsyncadd [#allocation3], 4294967040  ;;  %v28_v0 = vld [vmem:[#allocation2] sm:$0x3]  ;;  %vm69_vm0 = vcmask 254976   ;;  %s156_s0 = smov [#allocation5]  }
   0x7   :  { %v36_v1 = vld [vmem:[%s196_s1] sm:$0xff]  ;;  %v32_v15 = vld [vmem:[#allocation2 + $0x8] sm:$0x3]  ;;  %v33_v17 = vld [vmem:[#allocation2 + $0xa] sm:$0x3]  ;;  %s82_s1 = sshll.u32 %s156_s0, 4  ;;  %s83_s1 = int_to_ptr.vmem [resolvable:$true] %s82_s1 }
   0x8   :  { %v45_v2 = vperm.slane %v36_v1, 0  ;;  %v29_v3 = vld [vmem:[#allocation2 + $0x2] sm:$0x3]  ;;  %v38_v4 = vrot.slane %v36_v1, 1  ;;  %v39_v5 = vrot.slane %v36_v1, 2  ;;  %v40_v6 = vrot.slane %v36_v1, 3 }
   0x9   :  { %v30_v7 = vld [vmem:[#allocation2 + $0x4] sm:$0x3]  ;;  %v31_v8 = vld [vmem:[#allocation2 + $0x6] sm:$0x3]  ;;  %v41_v9 = vrot.slane %v36_v1, 4  ;;  %v42_v10 = vrot.slane %v36_v1, 5 }
   0xa   :  { %v61_v11 = vadd.f32 %v45_v2, %v28_v0  ;;  %v46_v12 = vperm.slane %v38_v4, 0  ;;  %v47_v13 = vperm.slane %v39_v5, 0  ;;  %v48_v14 = vperm.slane %v40_v6, 0  ;;  %v34_v24 = vld [vmem:[#allocation2 + $0xc] sm:$0x3]  ;;  %s84_s20 = sshll.u32 %s197_s2, 4  ;;  %s85_s20 = int_to_ptr.hbm [resolvable:$true] %s84_s20 }
   0xb   :  { %v49_v16 = vperm.slane %v41_v9, 0  ;;  %v50_v18 = vperm.slane %v42_v10, 0  ;;  %v43_v19 = vrot.slane %v36_v1, 6  ;;  %v44_v20 = vrot.slane %v36_v1, 7  ;;  %v35_v27 = vld [vmem:[#allocation2 + $0xe] sm:$0x3] }
   0xc   :  { %70 = vst.msk [vmem:[#allocation5] sm:$0x3] %vm69_vm0, %v61_v11  ;;  %v62_v21 = vadd.f32 %v46_v12, %v29_v3  ;;  %v63_v22 = vadd.f32 %v47_v13, %v30_v7  ;;  %v64_v23 = vadd.f32 %v48_v14, %v31_v8 }
   0xd   :  { %v65_v25 = vadd.f32 %v49_v16, %v32_v15  ;;  %v51_v26 = vperm.slane %v43_v19, 0  ;;  %v52_v28 = vperm.slane %v44_v20, 0  ;;  %v66_v29 = vadd.f32 %v50_v18, %v33_v17 }
   0xe   :  { %71 = vst.msk [vmem:[#allocation5 + $0x2] sm:$0x3] %vm69_vm0, %v62_v21 }
   0xf   :  { %72 = vst.msk [vmem:[#allocation5 + $0x4] sm:$0x3] %vm69_vm0, %v63_v22  ;;  %v67_v30 = vadd.f32 %v51_v26, %v34_v24  ;;  %v68_v31 = vadd.f32 %v52_v28, %v35_v27 }
  0x10   :  { %73 = vst.msk [vmem:[#allocation5 + $0x6] sm:$0x3] %vm69_vm0, %v64_v23 }
  0x11   :  { %74 = vst.msk [vmem:[#allocation5 + $0x8] sm:$0x3] %vm69_vm0, %v65_v25 }
  0x12   :  { %75 = vst.msk [vmem:[#allocation5 + $0xa] sm:$0x3] %vm69_vm0, %v66_v29 }
  0x13   :  { %76 = vst.msk [vmem:[#allocation5 + $0xc] sm:$0x3] %vm69_vm0, %v67_v30 }
  0x14   :  { %77 = vst.msk [vmem:[#allocation5 + $0xe] sm:$0x3] %vm69_vm0, %v68_v31 }
  0x15   :  { %90 = dma.vmem_to_hbm [thread:$0]  %s83_s1, 256, %s85_s20, [#allocation4], %s154_s14, %s154_s14, %s155_s15  }
  0x16   :  { %151 = dma.done.wait [#allocation4], 256  }
  0x17   :  { %152 = vsyncadd [#allocation4], 4294967040 }
  0x18   :  { %95 = vsyncpa [#allocation3], 1 }
  0x19   :  { %96 = vsyncpa [#allocation4], 1 }

</bundles_post_ra>
